<compile_context>
chip_gen: v6e
topology: v6e:2x2x1
jax: 0.10.0
libtpu: 0.0.40
codegen_flags: <defaults>
</compile_context>

<pallas_src>
import functools

import jax
import jax.numpy as jnp
from jax.experimental import pallas as pl
from jax.experimental.pallas import tpu as pltpu


def _round_up(n: int, m: int) -> int:
    return ((n + m - 1) // m) * m


def _gated_tanh_kernel(x_ref, w_ref, b_ref, o_ref, *, h_pad: int):
    # One fused MXU matmul: (tile_b, D_in) @ (D_in, 2*H_pad) -> (tile_b, 2*H_pad),
    # f32 accumulation. Bias add + gating stay fused in-kernel (VPU/EUP).
    h = jnp.dot(x_ref[...], w_ref[...], preferred_element_type=jnp.float32)
    h = h + b_ref[...]
    # h_pad is a multiple of 128, so this split is lane-aligned (no XLU permutes).
    h1 = h[:, :h_pad]
    h2 = h[:, h_pad:]
    o_ref[...] = (jnp.tanh(h1) * jax.nn.sigmoid(h2)).astype(o_ref.dtype)


def gated_tanh(x, w1, b1, w2, b2, *, tile_b=256, compute_dtype=None,
               vmem_limit_bytes=64 * 1024 * 1024):
    """Fused GatedTanh.

    x      : (B, D_in)
    w1, w2 : (H, D_in)   -- PyTorch nn.Linear weight layout
    b1, b2 : (H,)
    returns: (B, H) = tanh(x @ w1.T + b1) * sigmoid(x @ w2.T + b2)
    """
    B, D_in = x.shape
    H = w1.shape[0]
    out_dtype = x.dtype

    # Lane-dense hidden padding: each gate padded to a multiple of 128 lanes.
    H_pad = _round_up(max(H, 128), 128)

    # Batch tiling: big tiles; fall back to the (8-aligned) whole batch if small.
    tile_b = min(tile_b, _round_up(B, 8))
    B_pad = _round_up(B, tile_b)

    # Fuse the two linears into one weight/bias (wrapper-side layout plumbing only;
    # no compute is hoisted out of the kernel).
    def _pad_gate(w, b):
        wt = jnp.transpose(w)                                  # (D_in, H)
        wt = jnp.pad(wt, ((0, 0), (0, H_pad - H)))             # (D_in, H_pad)
        bb = jnp.pad(b.reshape(1, H), ((0, 0), (0, H_pad - H)))  # (1, H_pad)
        return wt, bb

    w1p, b1p = _pad_gate(w1, b1)
    w2p, b2p = _pad_gate(w2, b2)
    w = jnp.concatenate([w1p, w2p], axis=1)                    # (D_in, 2*H_pad)
    b = jnp.concatenate([b1p, b2p], axis=1)                    # (1, 2*H_pad)

    x_in = x
    if compute_dtype is not None:      # e.g. jnp.bfloat16 on v5e/v6e
        x_in = x_in.astype(compute_dtype)
        w = w.astype(compute_dtype)
    if B_pad != B:
        x_in = jnp.pad(x_in, ((0, B_pad - B), (0, 0)))

    grid = (B_pad // tile_b,)
    kernel = functools.partial(_gated_tanh_kernel, h_pad=H_pad)

    cost = pl.CostEstimate(
        flops=2 * B_pad * D_in * (2 * H_pad),
        transcendentals=2 * B_pad * H_pad,
        bytes_accessed=(
            x_in.size * x_in.dtype.itemsize
            + w.size * w.dtype.itemsize
            + b.size * b.dtype.itemsize
            + B_pad * H_pad * jnp.dtype(out_dtype).itemsize
        ),
    )

    out = pl.pallas_call(
        kernel,
        out_shape=jax.ShapeDtypeStruct((B_pad, H_pad), out_dtype),
        grid_spec=pltpu.PrefetchScalarGridSpec(
            num_scalar_prefetch=0,
            grid=grid,
            in_specs=[
                pl.BlockSpec((tile_b, D_in), lambda i: (i, 0)),      # x tile
                # Constant index_map -> fetched once, kept resident across the grid.
                pl.BlockSpec((D_in, 2 * H_pad), lambda i: (0, 0)),   # fused W1|W2
                pl.BlockSpec((1, 2 * H_pad), lambda i: (0, 0)),      # fused b1|b2
            ],
            # Lane-dense output: last dim H_pad is a multiple of 128.
            out_specs=pl.BlockSpec((tile_b, H_pad), lambda i: (i, 0)),
        ),
        compiler_params=pltpu.CompilerParams(
            dimension_semantics=("parallel",),   # megacore-shardable batch axis
            vmem_limit_bytes=vmem_limit_bytes,
        ),
        cost_estimate=cost,
    )(x_in, w, b)

    # Strip batch/hidden padding.
    return out[:B, :H]


def reference(x, w1, b1, w2, b2):
    h1 = x @ w1.T + b1
    h2 = x @ w2.T + b2
    return jnp.tanh(h1) * jax.nn.sigmoid(h2)


if __name__ == "__main__":
    # Small shapes consistent with the module: batch=16, input_size=32, hidden_size=32
    B, D_in, H = 16, 32, 32

    key = jax.random.PRNGKey(0)
    kx, k1, k2, k3, k4 = jax.random.split(key, 5)

    x = jax.random.normal(kx, (B, D_in), dtype=jnp.float32)
    # Deterministic "Linear" parameter init (uniform like PyTorch default, fixed seed).
    bound = 1.0 / (D_in ** 0.5)
    w1 = jax.random.uniform(k1, (H, D_in), minval=-bound, maxval=bound, dtype=jnp.float32)
    b1 = jax.random.uniform(k2, (H,), minval=-bound, maxval=bound, dtype=jnp.float32)
    w2 = jax.random.uniform(k3, (H, D_in), minval=-bound, maxval=bound, dtype=jnp.float32)
    b2 = jax.random.uniform(k4, (H,), minval=-bound, maxval=bound, dtype=jnp.float32)

    out = gated_tanh(x, w1, b1, w2, b2)
    out = jax.block_until_ready(out)

    ref = reference(x, w1, b1, w2, b2)
    assert out.shape == (B, H)
    assert jnp.allclose(out, ref, atol=1e-5, rtol=1e-5), "mismatch vs reference"

    print("KERNEL_OK")
</pallas_src>

<mosaic_0001>
module attributes {stable_mosaic.version = 11 : i64} {
  func.func @_gated_tanh_kernel(%arg0: i32, %arg1: memref<16x32xf32, #tpu.memory_space<vmem>>, %arg2: memref<32x256xf32, #tpu.memory_space<vmem>>, %arg3: memref<1x256xf32, #tpu.memory_space<vmem>>, %arg4: memref<16x128xf32, #tpu.memory_space<vmem>>) attributes {dimension_semantics = [#tpu.dimension_semantics<parallel>], iteration_bounds = array<i64: 1>, scalar_prefetch = 0 : i64, scratch_operands = 0 : i64, tpu.core_type = #tpu.core_type<tc>, window_params = [{transform_indices = @transform_0, window_bounds = array<i64: 16, 32>}, {pipeline_mode = #tpu.pipeline_mode<synchronous>, transform_indices = @transform_1, window_bounds = array<i64: 32, 256>}, {pipeline_mode = #tpu.pipeline_mode<synchronous>, transform_indices = @transform_2, window_bounds = array<i64: 1, 256>}, {transform_indices = @transform_3, window_bounds = array<i64: 16, 128>}]} {
    %c0 = arith.constant 0 : index
    %c0_0 = arith.constant 0 : index
    %0 = vector.load %arg1[%c0, %c0_0] : memref<16x32xf32, #tpu.memory_space<vmem>>, vector<16x32xf32>
    %c0_1 = arith.constant 0 : index
    %c0_2 = arith.constant 0 : index
    %1 = vector.load %arg2[%c0_1, %c0_2] : memref<32x256xf32, #tpu.memory_space<vmem>>, vector<32x256xf32>
    %cst = arith.constant dense<0.000000e+00> : vector<16x256xf32>
    %2 = tpu.matmul %0, %1, %cst {dimension_numbers = #tpu.dot_dimension_numbers<[1], [0], [0], [1], [0, 0, 1, 1], [], []>} : vector<16x32xf32>, vector<32x256xf32>, vector<16x256xf32> -> vector<16x256xf32>
    %c0_3 = arith.constant 0 : index
    %c0_4 = arith.constant 0 : index
    %3 = vector.load %arg3[%c0_3, %c0_4] : memref<1x256xf32, #tpu.memory_space<vmem>>, vector<1x256xf32>
    %4 = vector.broadcast %3 : vector<1x256xf32> to vector<16x256xf32>
    %5 = arith.addf %2, %4 : vector<16x256xf32>
    %6 = vector.extract_strided_slice %5 {offsets = [0, 0], sizes = [16, 128], strides = [1, 1]} : vector<16x256xf32> to vector<16x128xf32>
    %7 = vector.extract_strided_slice %5 {offsets = [0, 128], sizes = [16, 128], strides = [1, 1]} : vector<16x256xf32> to vector<16x128xf32>
    %8 = math.tanh %6 : vector<16x128xf32>
    %9 = arith.negf %7 : vector<16x128xf32>
    %10 = math.exp %9 : vector<16x128xf32>
    %cst_5 = arith.constant 1.000000e+00 : f32
    %11 = vector.broadcast %cst_5 : f32 to vector<16x128xf32>
    %12 = arith.addf %11, %10 : vector<16x128xf32>
    %13 = arith.divf %11, %12 : vector<16x128xf32>
    %14 = arith.mulf %8, %13 : vector<16x128xf32>
    %c0_6 = arith.constant 0 : index
    %c0_7 = arith.constant 0 : index
    %15 = vector.load %arg4[%c0_6, %c0_7] : memref<16x128xf32, #tpu.memory_space<vmem>>, vector<16x128xf32>
    tpu.vector_store %arg4[%c0_6, %c0_7], %14 {strides = array<i32>} : memref<16x128xf32, #tpu.memory_space<vmem>>, vector<16x128xf32>,
    return
  }
  func.func @transform_0(%arg0: i32) -> (i32, i32) {
    %c0_i32 = arith.constant 0 : i32
    %c0_i32_0 = arith.constant 0 : i32
    return %arg0, %c0_i32 : i32, i32
  }
  func.func @transform_1(%arg0: i32) -> (i32, i32) {
    %c0_i32 = arith.constant 0 : i32
    %c0_i32_0 = arith.constant 0 : i32
    %c0_i32_1 = arith.constant 0 : i32
    return %c0_i32, %c0_i32_0 : i32, i32
  }
  func.func @transform_2(%arg0: i32) -> (i32, i32) {
    %c0_i32 = arith.constant 0 : i32
    %c0_i32_0 = arith.constant 0 : i32
    %c0_i32_1 = arith.constant 0 : i32
    return %c0_i32, %c0_i32_0 : i32, i32
  }
  func.func @transform_3(%arg0: i32) -> (i32, i32) {
    %c0_i32 = arith.constant 0 : i32
    %c0_i32_0 = arith.constant 0 : i32
    return %arg0, %c0_i32 : i32, i32
  }
}

</mosaic_0001>

<bundles_post_ra>
// kernel: tpu_custom_call.1
= control target key start
LH: loop header
LB: loop body
LE: loop exit
PB: predicated region body
PF: predicated region fallthrough
CT: control target
= control target key end

     0   :  { %8 = vsyncpa [#allocation3], 0  ;;  %s329_s0 = inlined_call_operand.hbm [shape: f32[16,32], index: 0, kind: input, shape index: {}]   ;;  %s330_s1 = inlined_call_operand.hbm [shape: f32[32,256], index: 1, kind: input, shape index: {}]   ;;  %s331_s2 = inlined_call_operand.vmem [shape: f32[1,256], index: 2, kind: input, shape index: {}]   ;;  %s332_s3 = inlined_call_operand.hbm [shape: f32[16,128], index: 3, kind: output, shape index: {}]  }
   0x1   :  { %9 = vsyncpa [#allocation6], 0 }
   0x2   :  { %10 = vsyncpa [#allocation4], 0  ;;  %s283_s12 = smov [#allocation2]  }
   0x3   :  { %s16_s13 = sshll.u32 %s283_s12, 4  ;;  %s17_s13 = int_to_ptr.vmem [resolvable:$true] %s16_s13 }
   0x4   :  { %s225_s14 = scalar_lea.vmem %s17_s13, 256  ;;  %p230_p1 = scmp.lt.s32.totalorder %s17_s13, %s17_s13 }
   0x5   :  { %p226_p0 = scmp.ne.s32.totalorder %s17_s13, %s225_s14  ;;  %p231_p2 = scmp.lt.s32.totalorder %s225_s14, %s225_s14 }
   0x7   :  { %p232_p3 = por %p231_p2, %p230_p1 }
   0x9   :  { %p233_p4 = pnand %p232_p3, %p226_p0 }
   0xb   :  { %236 = shalt.err (!%p233_p4)
}
   0xc   :  { %s284_s15 = smov 128   ;;  %s285_s16 = smov 8  }
   0xd   :  { %22 = dma.hbm_to_vmem [thread:$0]  %s329_s0, 256, %s17_s13, [#allocation3], %s284_s15, %s284_s15, %s285_s16  }
   0xe   :  { %s286_s19 = smov [#allocation5]  }
   0xf   :  { %s28_s20 = sshll.u32 %s286_s19, 4  ;;  %s29_s20 = int_to_ptr.vmem [resolvable:$true] %s28_s20 }
  0x10   :  { %s245_s21 = scalar_lea.vmem %s29_s20, 1024  ;;  %p250_p6 = scmp.lt.s32.totalorder %s29_s20, %s29_s20 }
  0x11   :  { %p246_p5 = scmp.ne.s32.totalorder %s29_s20, %s245_s21  ;;  %p251_p7 = scmp.lt.s32.totalorder %s245_s21, %s245_s21 }
  0x13   :  { %p252_p8 = por %p251_p7, %p250_p6 }
  0x15   :  { %p253_p9 = pnand %p252_p8, %p246_p5 }
  0x17   :  { %256 = shalt.err (!%p253_p9)
}
  0x18   :  { %s287_s22 = smov 256   ;;  %s288_s23 = smov 16  }
  0x19   :  { %34 = dma.hbm_to_vmem [thread:$0]  %s330_s1, 1024, %s29_s20, [#allocation6], %s287_s22, %s287_s22, %s288_s23  }
  0x1a   :  { %277 = dma.done.wait [#allocation3], 256  }
  0x1b   :  { %278 = vsyncadd [#allocation3], 4294967040 }
  0x1c   :  { %279 = dma.done.wait [#allocation6], 1024  }
  0x1d   :  { %280 = vsyncadd [#allocation6], 4294966272  ;;  %v289_v0 = vmov 0.0   ;;  %v52_v1 = vld [vmem:[#allocation5 + $0x38] sm:$0xff]  ;;  %v51_v2 = vld [vmem:[#allocation5 + $0x30] sm:$0xff]  ;;  %vm65_vm0 = vcmask 261120   ;;  %v55_v11 = vlaneseq }
  0x1e   :  { %136 = vmatprep.mubr.f32.mxu0 %v289_v0  ;;  %142 = vmatprep.mubr.f32.mxu1 %v289_v0  ;;  %v50_v3 = vld [vmem:[#allocation5 + $0x28] sm:$0xff]  ;;  %v49_v4 = vld [vmem:[#allocation5 + $0x20] sm:$0xff]  ;;  %v48_v5 = vld [vmem:[#allocation5 + $0x18] sm:$0xff] }
  0x1f   :  { %96 = vmatprep.subr.mxu0 %v52_v1  ;;  %189 = vmatprep.subr.mxu1 %v52_v1  ;;  %v47_v6 = vld [vmem:[#allocation5 + $0x10] sm:$0xff]  ;;  %v46_v7 = vld [vmem:[#allocation5 + $0x8] sm:$0xff]  ;;  %v45_v8 = vld [vmem:[#allocation5] sm:$0xff]  ;;  %v56_v12 = vshrl.u32 %v55_v11, 7 }
  0x20   :  { %97 = vmatpush1.msra.mxu0 %v51_v2  ;;  %193 = vmatpush1.msra.mxu1 %v51_v2  ;;  %v43_v9 = vld [vmem:[#allocation2] sm:$0xff]  ;;  %v44_v10 = vld [vmem:[#allocation2 + $0x8] sm:$0xff] }
  0x21   :  { %98 = vmatprep.subr.mxu0 %v50_v3  ;;  %190 = vmatprep.subr.mxu1 %v50_v3  ;;  %v61_v13 = vsub.s32 1, %v56_v12  ;;  %v53_v14 = vld [vmem:[%s331_s2] sm:$0x3]  ;;  %v57_v24 = vsub.s32 0, %v56_v12  ;;  %s290_s2 = smov [#allocation7]  }
  0x22   :  { %99 = vmatpush1.msra.mxu0 %v49_v4  ;;  %194 = vmatpush1.msra.mxu1 %v49_v4  ;;  %s172_s26 = sshll.u32 %s290_s2, 4  ;;  %s173_s26 = int_to_ptr.vmem [resolvable:$true] %s172_s26 }
  0x23   :  { %100 = vmatprep.subr.mxu0 %v48_v5  ;;  %191 = vmatprep.subr.mxu1 %v48_v5  ;;  %v62_v15 = vrot.slane %v53_v14, %v61_v13  ;;  %v58_v25 = vrot.slane %v53_v14, %v57_v24  ;;  %s257_s27 = scalar_lea.vmem %s173_s26, 256  ;;  %p262_p11 = scmp.lt.s32.totalorder %s173_s26, %s173_s26 }
  0x24   :  { %101 = vmatpush1.msra.mxu0 %v47_v6  ;;  %195 = vmatpush1.msra.mxu1 %v47_v6  ;;  %p258_p10 = scmp.ne.s32.totalorder %s173_s26, %s257_s27  ;;  %p263_p12 = scmp.lt.s32.totalorder %s257_s27, %s257_s27 }
  0x25   :  { %102 = vmatprep.subr.mxu0 %v46_v7  ;;  %192 = vmatprep.subr.mxu1 %v46_v7 }
  0x26   :  { %103 = vmatpush1.msra.mxu0 %v45_v8  ;;  %196 = vmatpush1.msra.mxu1 %v45_v8  ;;  %p264_p13 = por %p263_p12, %p262_p11 }
  0x27   :  { %185 = vmatmul.mubr.msk.f32.vlgmr.msra.gmra.mxu0 %vm65_vm0, %v43_v9  ;;  %186 = vmatmul.mubr.msk.f32.vlgmr.msra.gmra.mxu1 %vm65_vm0, %v44_v10 }
  0x28   :  { %p265_p0 = pnand %p264_p13, %p258_p10 }
  0xe7   :  { %v138_v16 = vpop.f32.mrf.mxu0  ;;  %v144_v17 = vpop.f32.mrf.mxu1 }
  0xe8   :  { %v139_v26 = vadd.f32 %v138_v16, %v58_v25  ;;  %v145_v27 = vadd.f32 %v144_v17, %v58_v25 }
  0xe9   :  { %v140_v18 = vpop.f32.mrf.mxu0  ;;  %v146_v19 = vpop.f32.mrf.mxu1 }
  0xea   :  { %v141_v20 = vadd.f32 %v140_v18, %v62_v15  ;;  %v147_v21 = vadd.f32 %v146_v19, %v62_v15 }
  0xec   :  { %v187_v22 = vmul.f32 -1.442695, %v141_v20  ;;  %v188_v23 = vmul.f32 -1.442695, %v147_v21 }
  0xee   :  { %205 = vpow2.f32 %v187_v22 }
  0xef   :  { %207 = vpow2.f32 %v188_v23 }
  0xf0   :  { %209 = vtanh.f32 %v139_v26 }
  0xf1   :  { %211 = vtanh.f32 %v145_v27 }
  0xfb   :  { %v206_v28 = vpop.eup %205 }
  0xfc   :  { %v208_v29 = vpop.eup %207  ;;  %v157_v30 = vadd.f32 1.0, %v206_v28 }
  0xfd   :  { %v158_v31 = vadd.f32 1.0, %v208_v29  ;;  %v210_v32 = vpop.eup %209 }
  0xfe   :  { %213 = vrcp.f32 %v157_v30  ;;  %v212_v33 = vpop.eup %211 }
  0xff   :  { %215 = vrcp.f32 %v158_v31 }
 0x10b   :  { %v214_v34 = vpop.eup %213 }
 0x10c   :  { %v216_v35 = vpop.eup %215  ;;  %v163_v36 = vmul.f32 %v214_v34, %v210_v32 }
 0x10d   :  { %v164_v37 = vmul.f32 %v216_v35, %v212_v33 }
 0x10e   :  { %165 = vst [vmem:[#allocation7] sm:$0xff] %v163_v36 }
 0x10f   :  { %166 = vst [vmem:[#allocation7 + $0x8] sm:$0xff] %v164_v37 }
 0x110   :  { %268 = shalt.err (!%p265_p0)
}
 0x111   :  { %178 = dma.vmem_to_hbm [thread:$0]  %s173_s26, 256, %s332_s3, [#allocation4], %s284_s15, %s284_s15, %s285_s16  }
 0x112   :  { %281 = dma.done.wait [#allocation4], 256  }
 0x113   :  { %282 = vsyncadd [#allocation4], 4294967040 }
 0x114   :  { %182 = vsyncpa [#allocation3], 1 }
 0x115   :  { %183 = vsyncpa [#allocation6], 1 }
 0x116   :  { %184 = vsyncpa [#allocation4], 1 }

</bundles_post_ra>
